<compile_context>
chip_gen: v6e
topology: v6e:2x2x1
jax: 0.10.0
libtpu: 0.0.40
codegen_flags: <defaults>
</compile_context>

<pallas_src>
import numpy as np
import jax
import jax.numpy as jnp
from jax import lax
from jax.experimental import pallas as pl
from jax.experimental.pallas import tpu as pltpu


def _round_up(v, m):
    return ((v + m - 1) // m) * m


def _pick_tile_rows(h2, w2, c3, ocp, out_itemsize, *, vmem_budget, target_rows):
    """Largest row tile TH (<= h2) whose per-step VMEM footprint fits the budget,
    stopping once the GEMM row count TH*W2 reaches target_rows."""
    best = 1
    for th in range(1, h2 + 1):
        tm = th * w2
        step = (2 * (th + 2) * w2 * c3 * 2          # double-buffered bf16 activations (+halo)
                + 2 * tm * ocp * out_itemsize       # double-buffered output block
                + tm * ocp * 4                      # f32 accumulator value
                + 2 * 3 * c3 * ocp * 2)             # resident weights (counted conservatively x2)
        if step > vmem_budget:
            break
        best = th
        if tm >= target_rows:
            break
    return best


def _spdconv_kernel(x_ref, w_ref, b_ref, o_ref):
    """One grid step = one (batch, row-tile) block.

    x_ref : (1, TH+2, W2, 3*4C) bf16  dx-stacked activations incl. 2 halo rows
    w_ref : (3, 3*4C, OCp)      bf16  conv weights per dy, BN scale folded in
    b_ref : (1, OCp)            f32   folded BN bias
    o_ref : (1, TH*W2, OCp)           output pixels (row-major h, w), bf16
    """
    thp2, w2, c3 = x_ref.shape[1], x_ref.shape[2], x_ref.shape[3]
    th = thp2 - 2
    tm = th * w2
    ocp = o_ref.shape[2]

    xb = x_ref[0]                                    # (TH+2, W2, C3), one VMEM load
    acc = jnp.zeros((tm, ocp), jnp.float32)
    for dy in range(3):                              # dy taps = free leading-dim shifts
        a = xb[dy:dy + th].reshape(tm, c3)           # (TH*W2, C3) — merges leading dims only
        acc = acc + jnp.dot(a, w_ref[dy], preferred_element_type=jnp.float32)

    y = acc + b_ref[...]                             # folded BN bias
    y = y * jax.nn.sigmoid(y)                        # SiLU, f32 epilogue
    o_ref[0] = y.astype(o_ref.dtype)


def spdconv_forward(x_nchw, w_oihw, gamma, beta, run_mean, run_var, eps=1e-3, *,
                    out_dtype=jnp.float32, kernel_out_dtype=jnp.bfloat16,
                    vmem_budget_bytes=24 << 20, target_gemm_rows=2048):
    """SPDConv forward: NCHW input, OIHW conv weight (PyTorch layout) -> NCHW output.

    Matches ultralytics Conv: conv(k=3, s=1, p=1, bias=False) + BatchNorm2d(eps=1e-3) + SiLU.
    """
    N, C, H, W = x_nchw.shape
    assert H % 2 == 0 and W % 2 == 0
    H2, W2 = H // 2, W // 2
    C4 = 4 * C
    C3 = 3 * C4
    OC = w_oihw.shape[0]

    # ---- glue (plain JAX, fuses into a couple of XLA ops) ----------------------
    x = jnp.transpose(x_nchw, (0, 2, 3, 1)).astype(jnp.bfloat16)           # NHWC, bf16 early
    # space-to-depth, channel order matches torch.cat([::2,::2],[1::2,::2],[::2,1::2],[1::2,1::2])
    x_spd = jnp.concatenate(
        [x[:, ::2, ::2, :], x[:, 1::2, ::2, :], x[:, ::2, 1::2, :], x[:, 1::2, 1::2, :]],
        axis=-1)                                                            # (N,H2,W2,4C)
    # stack the 3 dx taps along channels (3x blow-up, not 9x); dy handled in-kernel
    xw = jnp.pad(x_spd, ((0, 0), (0, 0), (1, 1), (0, 0)))
    x3 = jnp.concatenate([xw[:, :, dx:dx + W2, :] for dx in range(3)], axis=-1)  # (N,H2,W2,3*4C)

    # ---- row tiling with a +2 halo ---------------------------------------------
    OCp = 128 if OC <= 128 else _round_up(OC, 256)   # lane-dense; >=256 keeps v6e/v7x MXU N full
    TH = _pick_tile_rows(H2, W2, C3, OCp, jnp.dtype(kernel_out_dtype).itemsize,
                         vmem_budget=vmem_budget_bytes, target_rows=target_gemm_rows)
    if N * pl.cdiv(H2, TH) < 2 and H2 >= 2:          # keep >=2 grid steps (v7x has 2 TensorCores)
        TH = pl.cdiv(H2, 2)
    n_t = pl.cdiv(H2, TH)
    H2p = n_t * TH
    G = N * n_t
    TM = TH * W2

    # top conv pad + bottom (conv pad + row-tile padding)
    x3p = jnp.pad(x3, ((0, 0), (1, H2p - H2 + 1), (0, 0), (0, 0)))          # (N, H2p+2, W2, C3)
    starts = (np.arange(n_t, dtype=np.int32) * TH)[:, None]
    idx = starts + np.arange(TH + 2, dtype=np.int32)[None, :]               # overlapping row windows
    x_tiles = x3p[:, idx].reshape(G, TH + 2, W2, C3)                        # only halo rows duplicated

    # ---- weights: OIHW -> HWIO, fold BN scale, pad OC lane-dense ----------------
    scale = (gamma / jnp.sqrt(run_var + eps)).astype(jnp.float32)           # (OC,)
    bias = (beta - run_mean * scale).astype(jnp.float32)                    # (OC,)
    w_hwio = jnp.transpose(w_oihw, (2, 3, 1, 0)).astype(jnp.float32)        # (3,3,4C,OC)
    w3 = (w_hwio * scale).reshape(3, C3, OC)                                # (dy, dx*4C+c, OC)
    w3 = jnp.pad(w3, ((0, 0), (0, 0), (0, OCp - OC))).astype(jnp.bfloat16)  # (3, C3, OCp)
    bias_p = jnp.pad(bias, (0, OCp - OC)).reshape(1, OCp)

    # ---- VMEM budget / cost hints -----------------------------------------------
    out_isz = jnp.dtype(kernel_out_dtype).itemsize
    step_bytes = (2 * (TH + 2) * W2 * C3 * 2 + 2 * TM * OCp * out_isz
                  + TM * OCp * 4 + 2 * 3 * C3 * OCp * 2)
    vmem_limit = int(min(48 << 20, max(16 << 20, 2 * step_bytes)))          # v7x-safe, > v5e default

    cost = pl.CostEstimate(
        flops=int(2 * G * TM * 3 * C3 * OCp),
        transcendentals=int(G * TM * OCp),
        bytes_accessed=int(G * (TH + 2) * W2 * C3 * 2 + 3 * C3 * OCp * 2 + OCp * 4
                           + G * TM * OCp * out_isz),
    )

    out = pl.pallas_call(
        _spdconv_kernel,
        out_shape=jax.ShapeDtypeStruct((G, TM, OCp), kernel_out_dtype),
        grid_spec=pltpu.PrefetchScalarGridSpec(
            num_scalar_prefetch=0,
            grid=(G,),
            in_specs=[
                pl.BlockSpec((1, TH + 2, W2, C3), lambda i: (i, 0, 0, 0)),  # row tile + halo
                pl.BlockSpec((3, C3, OCp), lambda i: (0, 0, 0)),            # weights: invariant
                pl.BlockSpec((1, OCp), lambda i: (0, 0)),                   # BN bias: invariant
            ],
            out_specs=pl.BlockSpec((1, TM, OCp), lambda i: (i, 0, 0)),
        ),
        compiler_params=pltpu.CompilerParams(
            dimension_semantics=("parallel",),
            vmem_limit_bytes=vmem_limit),
        cost_estimate=cost,
    )(x_tiles, w3, bias_p)

    # strip padding, NHWC -> NCHW to match the PyTorch module's output convention
    y = out.reshape(N, H2p, W2, OCp)[:, :H2, :, :OC]
    return jnp.transpose(y, (0, 3, 1, 2)).astype(out_dtype)


def spdconv_reference(x_nchw, w_oihw, gamma, beta, run_mean, run_var, eps=1e-3):
    """Pure-JAX f32 reference (lax.conv) for correctness check."""
    x = jnp.transpose(x_nchw, (0, 2, 3, 1))
    x_spd = jnp.concatenate(
        [x[:, ::2, ::2, :], x[:, 1::2, ::2, :], x[:, ::2, 1::2, :], x[:, 1::2, 1::2, :]],
        axis=-1)
    w_hwio = jnp.transpose(w_oihw, (2, 3, 1, 0))
    y = lax.conv_general_dilated(
        x_spd, w_hwio, window_strides=(1, 1), padding="SAME",
        dimension_numbers=("NHWC", "HWIO", "NHWC"))
    scale = gamma / jnp.sqrt(run_var + eps)
    bias = beta - run_mean * scale
    y = y * scale + bias
    y = y * jax.nn.sigmoid(y)
    return jnp.transpose(y, (0, 3, 1, 2))


if __name__ == "__main__":
    key = jax.random.PRNGKey(0)
    k_x, k_w, k_g, k_b, k_m, k_v = jax.random.split(key, 6)

    # small shapes consistent with the module: inc=4, ouc=8
    N, C, H, W = 2, 4, 16, 16
    OC = 8
    C4 = 4 * C

    x = jax.random.normal(k_x, (N, C, H, W), dtype=jnp.float32)
    # conv weight in PyTorch OIHW layout (ouc, 4*inc, 3, 3)
    w_oihw = jax.random.normal(k_w, (OC, C4, 3, 3), dtype=jnp.float32) * (1.0 / jnp.sqrt(9.0 * C4))
    # BatchNorm (eval-mode) parameters; eps=1e-3 matches ultralytics Conv's BatchNorm2d(eps=0.001)
    gamma = 1.0 + 0.1 * jax.random.normal(k_g, (OC,), dtype=jnp.float32)
    beta = 0.1 * jax.random.normal(k_b, (OC,), dtype=jnp.float32)
    run_mean = 0.05 * jax.random.normal(k_m, (OC,), dtype=jnp.float32)
    run_var = jnp.abs(1.0 + 0.1 * jax.random.normal(k_v, (OC,), dtype=jnp.float32))

    out = spdconv_forward(x, w_oihw, gamma, beta, run_mean, run_var)
    out = jax.block_until_ready(out)

    ref = spdconv_reference(x, w_oihw, gamma, beta, run_mean, run_var)
    assert out.shape == (N, OC, H // 2, W // 2)
    # bf16 MXU operands + bf16 kernel store (f32 accumulate): bf16-level tolerance vs f32 reference
    assert jnp.allclose(out, ref, atol=6e-2, rtol=6e-2), float(jnp.max(jnp.abs(out - ref)))

    print("KERNEL_OK")
</pallas_src>

<mosaic_0001>
module attributes {stable_mosaic.version = 11 : i64} {
  func.func @_spdconv_kernel(%arg0: i32, %arg1: memref<1x10x8x48xbf16, #tpu.memory_space<vmem>>, %arg2: memref<3x48x128xbf16, #tpu.memory_space<vmem>>, %arg3: memref<1x128xf32, #tpu.memory_space<vmem>>, %arg4: memref<1x64x128xbf16, #tpu.memory_space<vmem>>) attributes {dimension_semantics = [#tpu.dimension_semantics<parallel>], iteration_bounds = array<i64: 2>, scalar_prefetch = 0 : i64, scratch_operands = 0 : i64, tpu.core_type = #tpu.core_type<tc>, window_params = [{transform_indices = @transform_0, window_bounds = array<i64: 1, 10, 8, 48>}, {pipeline_mode = #tpu.pipeline_mode<synchronous>, transform_indices = @transform_1, window_bounds = array<i64: 3, 48, 128>}, {pipeline_mode = #tpu.pipeline_mode<synchronous>, transform_indices = @transform_2, window_bounds = array<i64: 1, 128>}, {transform_indices = @transform_3, window_bounds = array<i64: 1, 64, 128>}]} {
    %c0 = arith.constant 0 : index
    %c0_0 = arith.constant 0 : index
    %c0_1 = arith.constant 0 : index
    %c0_2 = arith.constant 0 : index
    %0 = vector.load %arg1[%c0, %c0_0, %c0_1, %c0_2] : memref<1x10x8x48xbf16, #tpu.memory_space<vmem>>, vector<1x10x8x48xbf16>
    %1 = vector.shape_cast %0 : vector<1x10x8x48xbf16> to vector<10x8x48xbf16>
    %cst = arith.constant 0.000000e+00 : f32
    %2 = vector.broadcast %cst : f32 to vector<64x128xf32>
    %3 = vector.extract_strided_slice %1 {offsets = [0, 0, 0], sizes = [8, 8, 48], strides = [1, 1, 1]} : vector<10x8x48xbf16> to vector<8x8x48xbf16>
    %4 = vector.shape_cast %3 : vector<8x8x48xbf16> to vector<64x48xbf16>
    %c0_3 = arith.constant 0 : index
    %c0_4 = arith.constant 0 : index
    %c0_5 = arith.constant 0 : index
    %5 = vector.load %arg2[%c0_3, %c0_4, %c0_5] : memref<3x48x128xbf16, #tpu.memory_space<vmem>>, vector<1x48x128xbf16>
    %6 = vector.shape_cast %5 : vector<1x48x128xbf16> to vector<48x128xbf16>
    %cst_6 = arith.constant dense<0.000000e+00> : vector<64x128xf32>
    %7 = tpu.matmul %4, %6, %cst_6 {dimension_numbers = #tpu.dot_dimension_numbers<[1], [0], [0], [1], [0, 0, 1, 1], [], []>} : vector<64x48xbf16>, vector<48x128xbf16>, vector<64x128xf32> -> vector<64x128xf32>
    %8 = arith.addf %2, %7 : vector<64x128xf32>
    %9 = vector.extract_strided_slice %1 {offsets = [1, 0, 0], sizes = [8, 8, 48], strides = [1, 1, 1]} : vector<10x8x48xbf16> to vector<8x8x48xbf16>
    %10 = vector.shape_cast %9 : vector<8x8x48xbf16> to vector<64x48xbf16>
    %c1 = arith.constant 1 : index
    %c0_7 = arith.constant 0 : index
    %c0_8 = arith.constant 0 : index
    %11 = vector.load %arg2[%c1, %c0_7, %c0_8] : memref<3x48x128xbf16, #tpu.memory_space<vmem>>, vector<1x48x128xbf16>
    %12 = vector.shape_cast %11 : vector<1x48x128xbf16> to vector<48x128xbf16>
    %cst_9 = arith.constant dense<0.000000e+00> : vector<64x128xf32>
    %13 = tpu.matmul %10, %12, %cst_9 {dimension_numbers = #tpu.dot_dimension_numbers<[1], [0], [0], [1], [0, 0, 1, 1], [], []>} : vector<64x48xbf16>, vector<48x128xbf16>, vector<64x128xf32> -> vector<64x128xf32>
    %14 = arith.addf %8, %13 : vector<64x128xf32>
    %15 = vector.extract_strided_slice %1 {offsets = [2, 0, 0], sizes = [8, 8, 48], strides = [1, 1, 1]} : vector<10x8x48xbf16> to vector<8x8x48xbf16>
    %16 = vector.shape_cast %15 : vector<8x8x48xbf16> to vector<64x48xbf16>
    %c2 = arith.constant 2 : index
    %c0_10 = arith.constant 0 : index
    %c0_11 = arith.constant 0 : index
    %17 = vector.load %arg2[%c2, %c0_10, %c0_11] : memref<3x48x128xbf16, #tpu.memory_space<vmem>>, vector<1x48x128xbf16>
    %18 = vector.shape_cast %17 : vector<1x48x128xbf16> to vector<48x128xbf16>
    %cst_12 = arith.constant dense<0.000000e+00> : vector<64x128xf32>
    %19 = tpu.matmul %16, %18, %cst_12 {dimension_numbers = #tpu.dot_dimension_numbers<[1], [0], [0], [1], [0, 0, 1, 1], [], []>} : vector<64x48xbf16>, vector<48x128xbf16>, vector<64x128xf32> -> vector<64x128xf32>
    %20 = arith.addf %14, %19 : vector<64x128xf32>
    %c0_13 = arith.constant 0 : index
    %c0_14 = arith.constant 0 : index
    %21 = vector.load %arg3[%c0_13, %c0_14] : memref<1x128xf32, #tpu.memory_space<vmem>>, vector<1x128xf32>
    %22 = vector.broadcast %21 : vector<1x128xf32> to vector<64x128xf32>
    %23 = arith.addf %20, %22 : vector<64x128xf32>
    %24 = arith.negf %23 : vector<64x128xf32>
    %25 = math.exp %24 : vector<64x128xf32>
    %cst_15 = arith.constant 1.000000e+00 : f32
    %26 = vector.broadcast %cst_15 : f32 to vector<64x128xf32>
    %27 = arith.addf %26, %25 : vector<64x128xf32>
    %28 = arith.divf %26, %27 : vector<64x128xf32>
    %29 = arith.mulf %23, %28 : vector<64x128xf32>
    %30 = arith.truncf %29 : vector<64x128xf32> to vector<64x128xbf16>
    %c0_16 = arith.constant 0 : index
    %c0_17 = arith.constant 0 : index
    %c0_18 = arith.constant 0 : index
    %31 = vector.load %arg4[%c0_16, %c0_17, %c0_18] : memref<1x64x128xbf16, #tpu.memory_space<vmem>>, vector<1x64x128xbf16>
    %32 = vector.shape_cast %31 : vector<1x64x128xbf16> to vector<64x128xbf16>
    %33 = vector.shape_cast %30 : vector<64x128xbf16> to vector<1x64x128xbf16>
    tpu.vector_store %arg4[%c0_16, %c0_17, %c0_18], %33 {strides = array<i32>} : memref<1x64x128xbf16, #tpu.memory_space<vmem>>, vector<1x64x128xbf16>,
    return
  }
  func.func @transform_0(%arg0: i32) -> (i32, i32, i32, i32) {
    %c0_i32 = arith.constant 0 : i32
    %c0_i32_0 = arith.constant 0 : i32
    %c0_i32_1 = arith.constant 0 : i32
    %c0_i32_2 = arith.constant 0 : i32
    return %arg0, %c0_i32, %c0_i32_0, %c0_i32_1 : i32, i32, i32, i32
  }
  func.func @transform_1(%arg0: i32) -> (i32, i32, i32) {
    %c0_i32 = arith.constant 0 : i32
    %c0_i32_0 = arith.constant 0 : i32
    %c0_i32_1 = arith.constant 0 : i32
    %c0_i32_2 = arith.constant 0 : i32
    return %c0_i32, %c0_i32_0, %c0_i32_1 : i32, i32, i32
  }
  func.func @transform_2(%arg0: i32) -> (i32, i32) {
    %c0_i32 = arith.constant 0 : i32
    %c0_i32_0 = arith.constant 0 : i32
    %c0_i32_1 = arith.constant 0 : i32
    return %c0_i32, %c0_i32_0 : i32, i32
  }
  func.func @transform_3(%arg0: i32) -> (i32, i32, i32) {
    %c0_i32 = arith.constant 0 : i32
    %c0_i32_0 = arith.constant 0 : i32
    %c0_i32_1 = arith.constant 0 : i32
    return %arg0, %c0_i32, %c0_i32_0 : i32, i32, i32
  }
}

</mosaic_0001>

<bundles_post_ra>
// kernel: tpu_custom_call.1
= control target key start
LH: loop header
LB: loop body
LE: loop exit
PB: predicated region body
PF: predicated region fallthrough
CT: control target
= control target key end

     0   :  { %8 = vsyncpa [#allocation3], 0  ;;  %s1410_s0 = inlined_call_operand.hbm [shape: bf16[2,10,8,48], index: 0, kind: input, shape index: {}]   ;;  %s1411_s1 = inlined_call_operand.hbm [shape: bf16[3,48,128], index: 1, kind: input, shape index: {}]   ;;  %s1412_s2 = inlined_call_operand.vmem [shape: f32[1,128], index: 2, kind: input, shape index: {}]   ;;  %s1413_s3 = inlined_call_operand.hbm [shape: bf16[2,64,128], index: 3, kind: output, shape index: {}]  }
   0x1   :  { %10 = vsyncpa [#allocation3 + $0x1], 0 }
   0x2   :  { %11 = vsyncpa [#allocation6], 0 }
   0x3   :  { %12 = vsyncpa [#allocation4], 0 }
   0x4   :  { %14 = vsyncpa [#allocation4 + $0x1], 0  ;;  %s1183_s12 = smov 0   ;;  %s1185_s13 = smov 0  }
   0x5   :  { %s1187_s14 = smov 0   ;;  %s1189_s15 = smov 0  }
   0x6 LB: > { %s1204_s16 = sadd.s32 4294967295, %s1154_s15   ;;  %s757_s17 = sadd.s32 4294967294, %s1154_s15   ;;  %s1154_s15 = sphi %s1189_s15, %s1435_s15   ;;  %s1150_s14 = sphi %s1187_s14, %s1434_s14   ;;  %s1146_s13 = sphi %s1185_s13, %s1433_s13   ;;  %s1142_s12 = sphi %s1183_s12, %s1432_s12  }
   0x7   : > { %p40_p0 = scmp.ne.s32.totalorder %s1146_s13, %s1142_s12  ;;  %p1414_p1 = scmp.eq.s32.totalorder %s1204_s16, 0 }
   0x8   : > { %p112_p3 = scmp.eq.s32.totalorder %s757_s17, 1  ;;  %p758_p5 = scmp.ge.s32.totalorder %s1154_s15, 1 }
   0x9   : > { %p1213_p4 = por %p1414_p1, %p40_p0  ;;  %p119_p7 = scmp.lt.s32.totalorder %s1154_s15, 3 }
   0xa   : > { %p1218_p6 = por %p112_p3, %p40_p0  ;;  %s1156_s21 = smov [#allocation5]  }
   0xb   : > { %s1418_s18 = scalar_select %p1213_p4, 1, 0 }
   0xc   : > { %s1419_s19 = scalar_select %p1218_p6, 1, 0 }
   0xd   : > { %p1223_p8 = pnand %p758_p5, %p119_p7  ;;  %s131_s22 = sshll.u32 %s1156_s21, 4  ;;  %s132_s22 = int_to_ptr.vmem [resolvable:$true] %s131_s22 }
   0xe   : > { %s1237_s24 = sadd.s32 1, %s1154_s15   ;;  %s27_s25 = sadd.s32 1, %s1150_s14 }
   0xf   : > { %s1420_s20 = scalar_select %p1223_p8, 1, 0 }
  0x10   : > { %p929_p9 = pneg %p1223_p8  ;;  %s24_s26 = ssub.s32 %s1154_s15, %s1237_s24 }
  0x11   : > { %s1043_s27 = scalar_lea.vmem %s132_s22, 1152  ;;  %p1051_p5 = scmp.lt.s32.totalorder %s132_s22, %s132_s22 }
  0x12   : > { %p1232_p11 = pnand %p929_p9, %p1414_p1  ;;  %p1044_p13 = scmp.ne.s32.totalorder %s132_s22, %s1043_s27 }
  0x13   : > { %p1052_p7 = scmp.lt.s32.totalorder %s1043_s27, %s1043_s27 }
  0x14   : > { %p1034_p12 = pneg %p1232_p11 }
  0x15   : > { %p1053_p10 = por %p1052_p7, %p1051_p5 }
  0x16   : > { %p1046_p0 = pnand %p1044_p13, %p1034_p12 }
  0x18   : > { %p1047_p3 = pneg %p1046_p0 }
  0x1a   : > { %p1054_p2 = pnand %p1053_p10, %p1047_p3 }
  0x1c   : > { %1057 = shalt.err (!%p1054_p2)
}
  0x1d   : > { %s1157_s28 = smov 64   ;;  %s1158_s29 = smov 4  }
  0x1e   : > { %932 = dma.hbm_to_vmem [thread:$0]  (!%p1232_p11), %s1411_s1, 1152, %s132_s22, [#allocation6], %s1157_s28, %s1157_s28, %s1158_s29  }
  0x1f   : > { %p25_p2 = scmp.eq.s32.totalorder %s24_s26, 0  ;;  %p34_p9 = scmp.ne.s32.totalorder %s1150_s14, %s1146_s13 }
  0x20   : > { %p35_p10 = scmp.eq.s32.totalorder %s1154_s15, 0  ;;  %p942_p12 = scmp.lt.s32.totalorder %s1154_s15, 2 }
  0x21   : > { %s1257_s5 = scalar_select %p25_p2, %s1150_s14, %s27_s25  }
  0x22   : > { %p36_p13 = por %p35_p10, %p34_p9  ;;  %p1422_p0 = scmp.eq.s32.totalorder %s1204_s16, 1 }
  0x23   : > { %s148_s7 = sand.u32 1, %s1150_s14   ;;  %s919_s8 = smul.u32 640, %s1154_s15 }
  0x24   : > { %p1261_p3 = por %p1422_p0, %p34_p9  ;;  %s918_s9 = smul.u32 40, %s148_s7 }
  0x25   : > { %p1267_p5 = pnand %p942_p12, %p36_p13  ;;  %s1274_s21 = scalar_lea.hbm %s1410_s0, %s919_s8 }
  0x26   : > { %s1423_s6 = scalar_select %p1261_p3, 1, 0 }
  0x27   : > { %s152_s22 = scalar_lea.vmem [#allocation2], %s918_s9  ;;  %s1278_s25 = scalar_lea.sflag [#allocation3], %s148_s7 }
  0x28   : > { %s159_s23 = sshll.u32 %s152_s22, 4  ;;  %s1058_s26 = scalar_lea.hbm %s1274_s21, 640  ;;  %s1276_s23 = int_to_ptr.vmem [resolvable:$true] %s159_s23 }
  0x29   : > { %p1059_p11 = scmp.ne.s32.totalorder %s1274_s21, %s1058_s26  ;;  %p1060_p7 = pneg %p1267_p5 }
  0x2a   : > { %s1063_s4 = scalar_lea.hbm %s1410_s0, 1280  ;;  %p1064_p10 = scmp.lt.s32.totalorder %s1274_s21, %s1410_s0 }
  0x2b   : > { %p1061_p2 = pnand %p1060_p7, %p1059_p11  ;;  %p1065_p12 = scmp.lt.s32.totalorder %s1063_s4, %s1058_s26 }
  0x2d   : > { %p1062_p9 = pneg %p1061_p2  ;;  %p1066_p13 = por %p1065_p12, %p1064_p10 }
  0x2f   : > { %p1067_p0 = pnand %p1066_p13, %p1062_p9 }
  0x31   : > { %1070 = shalt.err (!%p1067_p0)
}
  0x32   : > { %s1071_s7 = scalar_lea.vmem %s1276_s23, 640  ;;  %s1159_s9 = smov [#allocation2]  }
  0x33   : > { %p1072_p1 = scmp.ne.s32.totalorder %s1276_s23, %s1071_s7  ;;  %s1076_s17 = sshll.u32 %s1159_s9, 4  ;;  %s1077_s17 = int_to_ptr.vmem [resolvable:$false] %s1076_s17 }
  0x34   : > { %s1078_s22 = scalar_lea.vmem %s1077_s17, 1280  ;;  %p1079_p2 = scmp.lt.s32.totalorder %s1276_s23, %s1077_s17 }
  0x35   : > { %p1074_p6 = pnand %p1072_p1, %p1060_p7  ;;  %p1080_p3 = scmp.lt.s32.totalorder %s1078_s22, %s1071_s7 }
  0x37   : > { %p1075_p11 = pneg %p1074_p6  ;;  %p1081_p4 = por %p1080_p3, %p1079_p2 }
  0x39   : > { %p1082_p8 = pnand %p1081_p4, %p1075_p11 }
  0x3b   : > { %1085 = shalt.err (!%p1082_p8)
}
  0x3c   : > { %936 = dma.hbm_to_vmem [thread:$0]  (!%p1267_p5), %s1274_s21, 640, %s1276_s23, %s1278_s25, %s1157_s28, %s1157_s28, %s1158_s29  }
  0x3d   : > { %p1425_p1 = scmp.ne.s32.totalorder %s1420_s20, 0 }
  0x3e   : > { %s1305_s26 = sand.u32 (!%p1425_p1), 1, %s1146_s13   ;;  %p1426_p4 = scmp.ne.s32.totalorder (!%p1425_p1), %s1418_s18, 0 }
  0x3f   : > { %171 = sbr.rel (%p1425_p1) target bundleno = 355 (0x163), region = 32  ;;  %s174_s30 = scalar_lea.sflag (!%p1425_p1), [#allocation3], %s1305_s26 }
  0x40   : > { %s920_s27 = smul.u32 (!%p1425_p1), 40, %s1305_s26 }
  0x42   : > { %s1309_s4 = scalar_lea.vmem (!%p1425_p1), [#allocation2], %s920_s27 }
  0x44   : > { %1129 = dma.done.wait (%p1426_p4), %s174_s30, 640  }
  0x45   : > { %1131 = vsyncadd (%p1426_p4), %s174_s30, 4294966656  ;;  %p1427_p6 = scmp.eq.s32.totalorder %s1204_s16, 0 }
  0x47   : > { %1133 = dma.done.wait (%p1427_p6), [#allocation6], 1152   ;;  %p1428_p8 = pmov %p1427_p6 }
  0x48   : > { %v982_v0 = vld [vmem:[#allocation5 + $0x28] sm:$0xff]   ;;  %v983_v1 = vld [vmem:[#allocation5 + $0x10] sm:$0xff]   ;;  %v984_v2 = vld [vmem:[#allocation5 + $0x20] sm:$0xff]   ;;  %vm266_vm0 = vcmask 392192   ;;  %s764_s28 = sshll.u32 %s1305_s26, 5  ;;  %s825_s21 = sshll.u32 %s1204_s16, 9 }
  0x49   : > { %1135 = vsyncadd (%p1428_p8), [#allocation6], 4294966144  ;;  %870 = vmatprep.subr.bf16.mxu0 %v982_v0  ;;  %884 = vmatprep.subr.bf16.mxu1 %v983_v1  ;;  %v985_v3 = vld [vmem:[#allocation5 + $0x8] sm:$0xff]   ;;  %v986_v4 = vld [vmem:[#allocation5 + $0x18] sm:$0xff]   ;;  %s203_s29 = scalar_lea.vmem [#allocation7], %s764_s28  ;;  %s1367_s25 = scalar_lea.hbm %s1413_s3, %s825_s21 }
  0x4a   : > { %871 = vmatpush3.bf16.msra.mxu0 %v982_v0  ;;  %885 = vmatpush3.bf16.msra.mxu1 %v983_v1  ;;  %v987_v5 = vld [vmem:[#allocation5] sm:$0xff]   ;;  %v206_v6 = vld [vmem:[%s1309_s4 + $0x4] sm:$0xf]  ;;  %v205_v11 = vld [vmem:[%s1309_s4] sm:$0xf]  ;;  %s674_s10 = sshll.u32 %s203_s29, 4  ;;  %s1362_s10 = int_to_ptr.vmem [resolvable:$true] %s674_s10 }
  0x4b   : > { %872 = vmatprep.subr.bf16.mxu0 %v984_v2  ;;  %886 = vmatprep.subr.bf16.mxu1 %v985_v3  ;;  %v207_v7 = vld [vmem:[%s1309_s4 + $0x8] sm:$0xf]  ;;  %v208_v8 = vld [vmem:[%s1309_s4 + $0xc] sm:$0xf]  ;;  %v209_v9 = vld [vmem:[%s1309_s4 + $0x10] sm:$0xf]  ;;  %v776_v12 = vcombine.low %v205_v11, %v206_v6 }
  0x4c   : > { %v765_v10 = vcombine.low %v206_v6, %v207_v7  ;;  %v992_v13 = vld [vmem:[#allocation5 + $0x40] sm:$0xff]   ;;  %v766_v14 = vcombine.low %v208_v8, %v209_v9  ;;  %v211_v16 = vld [vmem:[%s1309_s4 + $0x18] sm:$0xf]  ;;  %v777_v17 = vcombine.low %v207_v7, %v208_v8  ;;  %v993_v18 = vld [vmem:[#allocation5 + $0x38] sm:$0xff]   ;;  %s661_s8 = scalar_lea.sflag [#allocation4], %s1305_s26  ;;  %s1086_s11 = scalar_lea.vmem %s1362_s10, 512 }
  0x4d   : > { %890 = vmatprep.mubr.msk.bf16.mxu1 %vm266_vm0, %v776_v12  ;;  %v210_v15 = vld [vmem:[%s1309_s4 + $0x14] sm:$0xf]  ;;  %v212_v21 = vld [vmem:[%s1309_s4 + $0x1c] sm:$0xf]  ;;  %v213_v22 = vld [vmem:[%s1309_s4 + $0x20] sm:$0xf]  ;;  %p1087_p3 = scmp.ne.s32.totalorder %s1362_s10, %s1086_s11 }
  0x4e   : > { %873 = vmatpush3.bf16.msra.mxu0 %v984_v2  ;;  %887 = vmatpush3.bf16.msra.mxu1 %v985_v3  ;;  %v767_v19 = vcombine.low %v210_v15, %v211_v16  ;;  %v778_v20 = vcombine.low %v209_v9, %v210_v15  ;;  %v999_v23 = vld [vmem:[#allocation5 + $0x30] sm:$0xff]   ;;  %v768_v24 = vcombine.low %v212_v21, %v213_v22  ;;  %p1429_p5 = scmp.ne.s32.totalorder %s1423_s6, 0  ;;  %s1160_s7 = smov [#allocation7]  }
  0x4f   : > { %874 = vmatprep.subr.bf16.mxu0 %v986_v4  ;;  %888 = vmatprep.subr.bf16.mxu1 %v987_v5  ;;  %v779_v25 = vcombine.low %v211_v16, %v212_v21  ;;  %v214_v26 = vld [vmem:[%s1309_s4 + $0x24] sm:$0xf]  ;;  %v795_v47 = vld [vmem:[%s1412_s2] ss:$0 sm:$0xff]  ;;  %s1090_s9 = sshll.u32 %s1160_s7, 4  ;;  %s1091_s9 = int_to_ptr.vmem [resolvable:$false] %s1090_s9 }
  0x50   : > { %876 = vmatprep.mubr.msk.bf16.mxu0 %vm266_vm0, %v765_v10  ;;  %v787_v27 = vcombine.low %v213_v22, %v214_v26  ;;  %p1088_p7 = pnand %p1087_p3, %p1429_p5  ;;  %s1092_s17 = scalar_lea.vmem %s1091_s9, 1024 }
  0x51   : > { %p1093_p10 = scmp.lt.s32.totalorder %s1362_s10, %s1091_s9  ;;  %p1094_p12 = scmp.lt.s32.totalorder %s1092_s17, %s1086_s11 }
  0x52   : > { %875 = vmatpush3.bf16.msra.mxu0 %v986_v4  ;;  %889 = vmatpush3.bf16.msra.mxu1 %v987_v5  ;;  %p1089_p9 = pneg %p1088_p7 }
  0x53   : > { %898 = vmatprep.subr.bf16.mxu0 %v992_v13  ;;  %912 = vmatprep.subr.bf16.mxu1 %v992_v13  ;;  %p1095_p13 = por %p1094_p12, %p1093_p10 }
  0x55   : > { %877 = vmatmul.mubr.msk.bf16.vlgmr.msra.gmra.mxu0 %vm266_vm0, %v766_v14  ;;  %891 = vmatmul.mubr.msk.bf16.vlgmr.msra.gmra.mxu1 %vm266_vm0, %v777_v17  ;;  %p1096_p0 = pnand %p1095_p13, %p1089_p9 }
  0x56   : > { %899 = vmatpush3.bf16.msra.mxu0 %v992_v13  ;;  %915 = vmatpush3.bf16.msra.mxu1 %v992_v13 }
  0x57   : > { %900 = vmatprep.subr.bf16.mxu0 %v993_v18  ;;  %913 = vmatprep.subr.bf16.mxu1 %v993_v18 }
  0x58   : > { %880 = vmatprep.mubr.msk.bf16.mxu0 %vm266_vm0, %v767_v19  ;;  %894 = vmatprep.mubr.msk.bf16.mxu1 %vm266_vm0, %v778_v20 }
  0x5a   : > { %901 = vmatpush3.bf16.msra.mxu0 %v993_v18  ;;  %916 = vmatpush3.bf16.msra.mxu1 %v993_v18 }
  0x5b   : > { %902 = vmatprep.subr.bf16.mxu0 %v999_v23  ;;  %914 = vmatprep.subr.bf16.mxu1 %v999_v23 }
  0x5d   : > { %881 = vmatmul.mubr.msk.bf16.gmra.mxu0 %vm266_vm0, %v768_v24  ;;  %895 = vmatmul.mubr.msk.bf16.gmra.mxu1 %vm266_vm0, %v779_v25 }
  0x5e   : > { %903 = vmatpush3.bf16.msra.mxu0 %v999_v23  ;;  %917 = vmatpush3.bf16.msra.mxu1 %v999_v23 }
  0x5f   : > { %904 = vmatprep.mubr.msk.bf16.mxu0 %vm266_vm0, %v777_v17  ;;  %908 = vmatprep.mubr.msk.bf16.mxu1 %vm266_vm0, %v779_v25 }
  0x65   : > { %905 = vmatmul.mubr.msk.bf16.vlgmr.msra.gmra.mxu0 %vm266_vm0, %v778_v20  ;;  %909 = vmatmul.mubr.msk.bf16.vlgmr.msra.gmra.mxu1 %vm266_vm0, %v787_v27 }
 0x115   : > { %v878_v28 = vpop.f32.mrf.mxu0  ;;  %v892_v29 = vpop.f32.mrf.mxu1 }
 0x116   : > { %v423_v43 = vadd.f32 %v892_v29, %v878_v28 }
 0x117   : > { %v313_v30 = vpop.f32.mrf.mxu0  ;;  %v414_v31 = vpop.f32.mrf.mxu1 }
 0x118   : > { %v415_v48 = vadd.f32 %v414_v31, %v313_v30 }
 0x119   : > { %v879_v32 = vpop.f32.mrf.mxu0  ;;  %v893_v33 = vpop.f32.mrf.mxu1 }
 0x11a   : > { %v426_v54 = vadd.f32 %v893_v33, %v879_v32 }
 0x11b   : > { %v316_v34 = vpop.f32.mrf.mxu0  ;;  %v417_v35 = vpop.f32.mrf.mxu1 }
 0x11c   : > { %v418_v62 = vadd.f32 %v417_v35, %v316_v34 }
 0x11d   : > { %v882_v36 = vpop.f32.mrf.mxu0  ;;  %v896_v37 = vpop.f32.mrf.mxu1 }
 0x11e   : > { %v439_v45 = vadd.f32 %v896_v37, %v882_v36 }
 0x11f   : > { %v329_v38 = vpop.f32.mrf.mxu0  ;;  %v430_v39 = vpop.f32.mrf.mxu1 }
 0x120   : > { %v431_v51 = vadd.f32 %v430_v39, %v329_v38 }
 0x121   : > { %v883_v40 = vpop.f32.mrf.mxu0  ;;  %v897_v41 = vpop.f32.mrf.mxu1 }
 0x122   : > { %v442_v58 = vadd.f32 %v897_v41, %v883_v40 }
 0x123   : > { %v332_v42 = vpop.f32.mrf.mxu0  ;;  %v433_v44 = vpop.f32.mrf.mxu1 }
 0x124   : > { %v434_v3 = vadd.f32 %v433_v44, %v332_v42 }
 0x125   : > { %v906_v46 = vpop.f32.mrf.mxu0  ;;  %v910_v50 = vpop.f32.mrf.mxu1 }
 0x126   : > { %v543_v49 = vadd.f32 %v906_v46, %v423_v43  ;;  %v547_v52 = vadd.f32 %v910_v50, %v439_v45 }
 0x127   : > { %v510_v53 = vpop.f32.mrf.mxu0  ;;  %v526_v57 = vpop.f32.mrf.mxu1 }
 0x128   : > { %v1344_v55 = vadd.f32 %v795_v47, %v543_v49  ;;  %v541_v56 = vadd.f32 %v510_v53, %v415_v48  ;;  %v1346_v59 = vadd.f32 %v795_v47, %v547_v52  ;;  %v545_v60 = vadd.f32 %v526_v57, %v431_v51 }
 0x129   : > { %v907_v61 = vpop.f32.mrf.mxu0  ;;  %v911_v2 = vpop.f32.mrf.mxu1 }
 0x12a   : > { %v798_v63 = vmul.f32 -1.442695, %v1344_v55  ;;  %v1349_v0 = vadd.f32 %v795_v47, %v541_v56  ;;  %v544_v1 = vadd.f32 %v907_v61, %v426_v54  ;;  %v802_v4 = vmul.f32 -1.442695, %v1346_v59 }
 0x12b   : > { %v1352_v5 = vadd.f32 %v795_v47, %v545_v60  ;;  %v548_v6 = vadd.f32 %v911_v2, %v442_v58  ;;  %v513_v7 = vpop.f32.mrf.mxu0  ;;  %v529_v11 = vpop.f32.mrf.mxu1 }
 0x12c   : > { %1000 = vpow2.f32 %v798_v63  ;;  %v796_v8 = vmul.f32 -1.442695, %v1349_v0  ;;  %v559_v9 = vadd.f32 %v795_v47, %v544_v1  ;;  %v542_v10 = vadd.f32 %v513_v7, %v418_v62 }
 0x12d   : > { %1002 = vpow2.f32 %v802_v4  ;;  %v800_v12 = vmul.f32 -1.442695, %v1352_v5  ;;  %v563_v13 = vadd.f32 %v795_v47, %v548_v6  ;;  %v546_v14 = vadd.f32 %v529_v11, %v434_v3 }
 0x12e   : > { %1004 = vpow2.f32 %v796_v8  ;;  %v799_v15 = vmul.f32 -1.442695, %v559_v9  ;;  %v557_v16 = vadd.f32 %v795_v47, %v542_v10 }
 0x12f   : > { %1006 = vpow2.f32 %v800_v12  ;;  %v803_v17 = vmul.f32 -1.442695, %v563_v13  ;;  %v561_v18 = vadd.f32 %v795_v47, %v546_v14 }
 0x130   : > { %1008 = vpow2.f32 %v799_v15  ;;  %v797_v19 = vmul.f32 -1.442695, %v557_v16 }
 0x131   : > { %1010 = vpow2.f32 %v803_v17  ;;  %v801_v20 = vmul.f32 -1.442695, %v561_v18 }
 0x132   : > { %1012 = vpow2.f32 %v797_v19 }
 0x133   : > { %1014 = vpow2.f32 %v801_v20 }
 0x139   : > { %v1001_v21 = vpop.eup %1000 }
 0x13a   : > { %v1003_v22 = vpop.eup %1002  ;;  %v590_v23 = vadd.f32 1.0, %v1001_v21 }
 0x13b   : > { %v1005_v24 = vpop.eup %1004  ;;  %v594_v25 = vadd.f32 1.0, %v1003_v22 }
 0x13c   : > { %v1007_v26 = vpop.eup %1006  ;;  %1016 = vrcp.f32 %v590_v23  ;;  %v588_v27 = vadd.f32 1.0, %v1005_v24 }
 0x13d   : > { %v1009_v28 = vpop.eup %1008  ;;  %1018 = vrcp.f32 %v594_v25  ;;  %v592_v29 = vadd.f32 1.0, %v1007_v26 }
 0x13e   : > { %v1011_v30 = vpop.eup %1010  ;;  %1020 = vrcp.f32 %v588_v27  ;;  %v591_v31 = vadd.f32 1.0, %v1009_v28 }
 0x13f   : > { %v1013_v32 = vpop.eup %1012  ;;  %1022 = vrcp.f32 %v592_v29  ;;  %v595_v33 = vadd.f32 1.0, %v1011_v30 }
 0x140   : > { %v1015_v34 = vpop.eup %1014  ;;  %1024 = vrcp.f32 %v591_v31  ;;  %v589_v35 = vadd.f32 1.0, %v1013_v32 }
 0x141   : > { %1026 = vrcp.f32 %v595_v33  ;;  %v593_v36 = vadd.f32 1.0, %v1015_v34 }
 0x142   : > { %1028 = vrcp.f32 %v589_v35 }
 0x143   : > { %1030 = vrcp.f32 %v593_v36 }
 0x149   : > { %v1017_v37 = vpop.eup %1016 }
 0x14a   : > { %v1019_v38 = vpop.eup %1018  ;;  %v614_v43 = vmul.f32 %v1017_v37, %v1344_v55 }
 0x14b   : > { %v1021_v39 = vpop.eup %1020  ;;  %v618_v46 = vmul.f32 %v1019_v38, %v1346_v59 }
 0x14c   : > { %v1023_v40 = vpop.eup %1022  ;;  %v612_v49 = vmul.f32 %v1021_v39, %v1349_v0 }
 0x14d   : > { %v1025_v41 = vpop.eup %1024  ;;  %v616_v52 = vmul.f32 %v1023_v40, %v1352_v5 }
 0x14e   : > { %v1027_v42 = vpop.eup %1026  ;;  %v615_v44 = vmul.f32 %v1025_v41, %v559_v9 }
 0x14f   : > { %v1029_v45 = vpop.eup %1028  ;;  %v619_v47 = vmul.f32 %v1027_v42, %v563_v13 }
 0x150   : > { %v1031_v48 = vpop.eup %1030  ;;  %v834_v50 = vpack.c.bf16 %v615_v44, %v614_v43  ;;  %v613_v51 = vmul.f32 %v1029_v45, %v557_v16 }
 0x151   : > { %v844_v53 = vpack.c.bf16 %v619_v47, %v618_v46  ;;  %v617_v54 = vmul.f32 %v1031_v48, %v561_v18 }
 0x152   : > { %846 = vst [vmem:[%s203_s29 + $0x8] sm:$0xff] %v834_v50   ;;  %v829_v55 = vpack.c.bf16 %v613_v51, %v612_v49 }
 0x153   : > { %848 = vst [vmem:[%s203_s29 + $0x18] sm:$0xff] %v844_v53   ;;  %v839_v56 = vpack.c.bf16 %v617_v54, %v616_v52 }
 0x154   : > { %830 = vst [vmem:[%s203_s29] sm:$0xff] %v829_v55  }
 0x155   : > { %847 = vst [vmem:[%s203_s29 + $0x10] sm:$0xff] %v839_v56  }
 0x156   : > { %1099 = shalt.err (!%p1096_p0)
}
 0x157   : > { %s1100_s22 = scalar_lea.hbm %s1367_s25, 512  ;;  %s1104_s4 = scalar_lea.hbm %s1413_s3, 1024 }
 0x158   : > { %p1101_p11 = scmp.ne.s32.totalorder %s1367_s25, %s1100_s22  ;;  %p1105_p4 = scmp.lt.s32.totalorder %s1367_s25, %s1413_s3 }
 0x159   : > { %p1106_p6 = scmp.lt.s32.totalorder %s1104_s4, %s1100_s22 }
 0x15a   : > { %p1102_p2 = pnand %p1101_p11, %p1429_p5 }
 0x15b   : > { %p1107_p8 = por %p1106_p6, %p1105_p4 }
 0x15c   : > { %p1103_p1 = pneg %p1102_p2 }
 0x15e   : > { %p1108_p3 = pnand %p1107_p8, %p1103_p1 }
 0x160   : > { %1111 = shalt.err (!%p1108_p3)
}
 0x161   : > { %s1161_s28 = smov 64   ;;  %s1162_s29 = smov 4  }
 0x162   : > { %927 = dma.vmem_to_hbm [thread:$0]  (%p1429_p5), %s1362_s10, 512, %s1367_s25, %s661_s8, %s1161_s28, %s1161_s28, %s1162_s29  }
 0x163 PF: > { %s689_s21 = sand.u32 1, %s1142_s12   ;;  %p1430_p7 = scmp.ne.s32.totalorder %s1419_s19, 0 }
 0x164   : > { %p1431_p9 = scmp.ge.s32.totalorder %s1154_s15, 2  ;;  %s690_s23 = scalar_lea.sflag [#allocation4], %s689_s21 }
 0x166   : > { %p938_p10 = pnand %p1431_p9, %p1430_p7 }
 0x168   : > { %p939_p12 = pneg %p938_p10 }
 0x16a   : > { %1137 = dma.done.wait (%p939_p12), %s690_s23, 512  }
 0x16b   : > { %1139 = vsyncadd (%p939_p12), %s690_s23, 4294966784  ;;  %p17_p13 = scmp.ge.s32.totalorder %s1237_s24, 4   ;;  %s1432_s12 = smov %s1146_s13 }
 0x16c   : > { %s1433_s13 = smov %s1150_s14  ;;  %s1434_s14 = smov %s1257_s5 }
 0x16d   : > { %s1435_s15 = smov %s1237_s24  ;;  %19 = sbr.rel (!%p17_p13) target bundleno = 6 (0x6), region = 83 }
 0x172   :  { %695 = vsyncpa [#allocation3], 1 }
 0x173   :  { %697 = vsyncpa [#allocation3 + $0x1], 1 }
 0x174   :  { %698 = vsyncpa [#allocation6], 1 }
 0x175   :  { %699 = vsyncpa [#allocation4], 1 }
 0x176   :  { %701 = vsyncpa [#allocation4 + $0x1], 1 }

</bundles_post_ra>
